<compile_context>
chip_gen: v6e
topology: v6e:2x2x1
jax: 0.10.0
libtpu: 0.0.40
codegen_flags: <defaults>
</compile_context>

<pallas_src>
import jax
import jax.numpy as jnp
from jax.experimental import pallas as pl
from jax.experimental.pallas import tpu as pltpu


_FAST_PATH_ELEMS = 1 << 18  # below ~256K elements, padding/launch overhead dominates


def _round_up(x: int, m: int) -> int:
    return ((x + m - 1) // m) * m


def _vmem_capacity_bytes() -> int:
    """Physical VMEM per TensorCore; conservative 64 MiB fallback (v7x floor)."""
    try:
        cap = getattr(pltpu.get_tpu_info(), "vmem_capacity_bytes", None)
        if cap:
            return int(cap)
    except Exception:
        pass
    return 64 << 20


def _select_tiles(N, N2, Hp, cd_bytes, out_bytes, budget, tile_i=None, tile_j=None):
    """Pick (tile_i, tile_j, row_buffer_count, vmem_need) within the VMEM budget.

    tile_i is the arithmetic-intensity lever: each streamed h_transpose column
    byte delivers ~tile_i flops, so grow it as far as the per-generation VMEM
    budget allows (~1024 on 128 MiB chips, ~512 on v7x's 64 MiB for moderate H).
    tile_j stays 128/256 so output stores are lane-dense.
    """
    n_rows = _round_up(N, 128)
    n_cols = _round_up(N2, 128)

    if tile_j is None:
        tile_j = 256 if (n_cols >= 256 and n_cols % 256 == 0) else 128
    assert tile_j % 128 == 0, tile_j
    tile_j = min(tile_j, n_cols)

    def cost(ti, rbuf):
        return (Hp * Hp * cd_bytes               # M (single-buffered constant)
                + rbuf * ti * Hp * cd_bytes      # h row block buffer(s)
                + 2 * Hp * tile_j * cd_bytes     # h_transpose column block (x2)
                + 2 * ti * tile_j * out_bytes    # output block (x2)
                + ti * Hp * cd_bytes)            # hm scratch

    if tile_i is not None:
        assert tile_i % 128 == 0, tile_i
        ti = min(tile_i, n_rows)
        rbuf = 2 if cost(ti, 2) <= budget else 1
        return ti, tile_j, rbuf, cost(ti, rbuf)

    # Prefer tiles that minimize padded rows, then the largest tile; prefer
    # double-buffered rows, dropping to a single buffer before shrinking tile_i.
    cands = list(range(min(1024, n_rows), 127, -128))
    cands.sort(key=lambda c: (_round_up(N, c), -c))
    for ti in cands:
        for rbuf in (2, 1):
            if cost(ti, rbuf) <= budget:
                return ti, tile_j, rbuf, cost(ti, rbuf)
    return 128, tile_j, 1, cost(128, 1)  # over budget: let Mosaic try anyway


def _metric_tensor_kernel(h_row_ref, m_ref, ht_col_ref, o_ref, hm_ref):
    # hm = h_i @ M: computed once per row block (at j == 0), cached in VMEM in
    # the compute dtype and reused for every column block j.
    @pl.when(pl.program_id(1) == 0)
    def _():
        hm = jnp.dot(h_row_ref[...], m_ref[...],
                     preferred_element_type=jnp.float32)
        hm_ref[...] = hm.astype(hm_ref.dtype)

    # out_ij = hm_i @ (h_transpose)_j  -- plain MXU matmul, no in-kernel transpose.
    out = jnp.dot(hm_ref[...], ht_col_ref[...],
                  preferred_element_type=jnp.float32)
    o_ref[...] = out.astype(o_ref.dtype)


def metric_tensor_forward(h, M, h_transpose=None, *,
                          compute_dtype=jnp.bfloat16,
                          out_dtype=jnp.float32,
                          tile_i=None, tile_j=None,
                          force_pallas=False):
    """out = h @ M @ h_transpose (MetricTensor.forward) as a tiled Pallas TPU kernel.

    * h_transpose is used as the real right operand (any (H, N2) matrix); pass h.T
      for the module's usual call pattern (defaults to h.T when None).
    * MXU runs in `compute_dtype` (bf16) with f32 accumulation.  The cached
      h @ M intermediate is stored in `compute_dtype` -- one extra quantization vs
      the f32 PyTorch reference (grows with H); use compute_dtype=float32 if
      tighter accuracy is needed.
    * out_dtype=bfloat16 halves output writeback (useful on v5e) when tolerated.
    * Tiny problems (the module's nominal N=8, H=32) take an XLA fast path.
    """
    N, H = h.shape
    assert M.shape == (H, H), (M.shape, H)
    if h_transpose is None:
        h_transpose = h.T
    Ht, N2 = h_transpose.shape
    assert Ht == H, (h_transpose.shape, H)

    # Small-problem fast path: padding e.g. 8x32 up to MXU tiles wastes >200x the
    # compute and the per-step / launch overhead dwarfs the matmul.
    if not force_pallas and N * H <= _FAST_PATH_ELEMS and H * N2 <= _FAST_PATH_ELEMS:
        return (h @ M @ h_transpose).astype(out_dtype)

    cd = jnp.dtype(compute_dtype)
    od = jnp.dtype(out_dtype)
    Hp = _round_up(H, 128)

    vmem_cap = _vmem_capacity_bytes()
    tile_i, tile_j, row_buf, _need = _select_tiles(
        N, N2, Hp, cd.itemsize, od.itemsize, int(0.8 * vmem_cap),
        tile_i=tile_i, tile_j=tile_j)

    Np = _round_up(N, tile_i)
    N2p = _round_up(N2, tile_j)
    ni, nj = Np // tile_i, N2p // tile_j

    hc = h.astype(compute_dtype)
    Mc = M.astype(compute_dtype)
    htc = h_transpose.astype(compute_dtype)
    # Skip padding entirely when shapes are already tile-aligned.
    if (Np, Hp) != (N, H):
        hc = jnp.pad(hc, ((0, Np - N), (0, Hp - H)))
    if Hp != H:
        Mc = jnp.pad(Mc, ((0, Hp - H), (0, Hp - H)))
    if (Hp, N2p) != (H, N2):
        htc = jnp.pad(htc, ((0, Hp - H), (0, N2p - N2)))

    flops = 2 * Np * Hp * Hp + 2 * Np * N2p * Hp
    bytes_accessed = (Np * Hp * cd.itemsize           # h row blocks (read once)
                      + Hp * Hp * cd.itemsize         # M (read once, resident)
                      + ni * Hp * N2p * cd.itemsize   # h_transpose cols, re-read per row block
                      + Np * N2p * od.itemsize)       # output writeback

    # Honest VMEM accounting (no 2x double count); sized for worst-case buffering
    # so the same limit also covers the no-pipeline_mode fallback; capped at the
    # per-generation physical capacity instead of a hard 64 MiB.
    worst_case = (2 * Hp * Hp * cd.itemsize
                  + 2 * tile_i * Hp * cd.itemsize
                  + 2 * Hp * tile_j * cd.itemsize
                  + 2 * tile_i * tile_j * od.itemsize
                  + tile_i * Hp * cd.itemsize)
    vmem_limit = int(min(max(worst_case + (4 << 20), 32 << 20), vmem_cap))

    # TODO(synk): for very large H (resident bf16 M exceeding the VMEM budget,
    # ~5K+ on v7x), add a k grid axis that K-tiles M with f32 accumulation of hm
    # instead of keeping the full (Hp, Hp) block resident.

    def build(use_buffered):
        def spec(shape, index_map, bufs):
            if use_buffered and bufs is not None:
                return pl.BlockSpec(shape, index_map,
                                    pipeline_mode=pl.Buffered(bufs))
            return pl.BlockSpec(shape, index_map)

        return pl.pallas_call(
            _metric_tensor_kernel,
            out_shape=jax.ShapeDtypeStruct((Np, N2p), out_dtype),
            grid_spec=pltpu.PrefetchScalarGridSpec(
                num_scalar_prefetch=0,
                grid=(ni, nj),
                in_specs=[
                    # h row block: index changes only every nj steps; drops to a
                    # single buffer when VMEM is tight (re-DMA amortized over j).
                    spec((tile_i, Hp), lambda i, j: (i, 0), row_buf),
                    # M: constant block -> single buffer (double-buffering a
                    # constant never overlaps anything, only burns VMEM).
                    spec((Hp, Hp), lambda i, j: (0, 0), 1),
                    # h_transpose column block: streamed, default double buffer
                    # (only deepen if a trace shows exposed DMA once the j-sweep
                    # is compute-bound).
                    spec((Hp, tile_j), lambda i, j: (0, j), None),
                ],
                out_specs=pl.BlockSpec((tile_i, tile_j), lambda i, j: (i, j)),
                scratch_shapes=[pltpu.VMEM((tile_i, Hp), compute_dtype)],
            ),
            compiler_params=pltpu.CompilerParams(
                # i blocks are independent (sharded across v7x's 2 TensorCores);
                # j stays sequential because the hm scratch is filled at j == 0.
                dimension_semantics=("parallel", "arbitrary"),
                vmem_limit_bytes=vmem_limit,
            ),
            cost_estimate=pl.CostEstimate(
                flops=flops, transcendentals=0, bytes_accessed=bytes_accessed),
        )

    try:
        out_padded = build(use_buffered=True)(hc, Mc, htc)
    except Exception:
        # pipeline_mode / pl.Buffered unavailable on this jax version: fall back
        # to default (double-buffered) BlockSpecs -- same structure, more VMEM.
        out_padded = build(use_buffered=False)(hc, Mc, htc)

    if (Np, N2p) != (N, N2):
        out_padded = out_padded[:N, :N2]
    return out_padded


def _bf16_reference(h, M, rhs):
    """Matched-precision reference: bf16 operands, f32 accumulation, bf16 hm."""
    hb = h.astype(jnp.bfloat16)
    Mb = M.astype(jnp.bfloat16)
    rb = rhs.astype(jnp.bfloat16)
    hm = jnp.dot(hb, Mb, preferred_element_type=jnp.float32).astype(jnp.bfloat16)
    return jnp.dot(hm, rb, preferred_element_type=jnp.float32)


if __name__ == "__main__":
    key = jax.random.PRNGKey(0)
    k1, k2, k3, k4, k5 = jax.random.split(key, 5)

    # 1) Module-nominal shape (seq N=8, hidden_features=32): XLA fast path.
    N, H = 8, 32
    h = jax.random.normal(k1, (N, H), dtype=jnp.float32)
    # Parameter M: module __init__ uses zeros; random init so output is non-trivial.
    M = jax.random.normal(k2, (H, H), dtype=jnp.float32)
    out_small = jax.block_until_ready(metric_tensor_forward(h, M, h.T))
    assert out_small.shape == (N, N)
    assert jnp.allclose(out_small, h @ M @ h.T, atol=1e-3, rtol=1e-3)

    # 2) Same shape forced through the Pallas kernel (smoke-test the kernel path).
    out_small_pl = jax.block_until_ready(
        metric_tensor_forward(h, M, h.T, force_pallas=True))
    assert out_small_pl.shape == (N, N)
    ref_small = _bf16_reference(h, M, h.T)
    assert jnp.allclose(out_small_pl, ref_small, atol=2e-2, rtol=2e-2), float(
        jnp.max(jnp.abs(out_small_pl - ref_small)))

    # 3) Multi-block (2 x 3 grid) case with a general right operand (h_transpose
    #    need not be h.T), exercising the hm cache across the j sweep.
    Nb, Hb, N2b = 512, 256, 384
    hb = jax.random.normal(k3, (Nb, Hb), dtype=jnp.float32)
    Mb = jax.random.normal(k4, (Hb, Hb), dtype=jnp.float32)
    rhs = jax.random.normal(k5, (Hb, N2b), dtype=jnp.float32)
    out_big = jax.block_until_ready(
        metric_tensor_forward(hb, Mb, rhs, force_pallas=True,
                              tile_i=256, tile_j=128))
    ref_big = _bf16_reference(hb, Mb, rhs)
    assert out_big.shape == (Nb, N2b)
    assert jnp.allclose(out_big, ref_big, atol=1e-1, rtol=2e-2), float(
        jnp.max(jnp.abs(out_big - ref_big)))

    print("KERNEL_OK")
</pallas_src>

<mosaic_0001>
module attributes {stable_mosaic.version = 11 : i64} {
  func.func @_metric_tensor_kernel(%arg0: i32, %arg1: i32, %arg2: memref<128x128xbf16, #tpu.memory_space<vmem>>, %arg3: memref<128x128xbf16, #tpu.memory_space<vmem>>, %arg4: memref<128x128xbf16, #tpu.memory_space<vmem>>, %arg5: memref<128x128xf32, #tpu.memory_space<vmem>>, %arg6: memref<128x128xbf16, #tpu.memory_space<vmem>>) attributes {dimension_semantics = [#tpu.dimension_semantics<parallel>, #tpu.dimension_semantics<arbitrary>], iteration_bounds = array<i64: 1, 1>, scalar_prefetch = 0 : i64, scratch_operands = 1 : i64, tpu.core_type = #tpu.core_type<tc>, window_params = [{pipeline_mode = #tpu.pipeline_mode<double_buffered>, transform_indices = @transform_0, window_bounds = array<i64: 128, 128>}, {pipeline_mode = #tpu.pipeline_mode<synchronous>, transform_indices = @transform_1, window_bounds = array<i64: 128, 128>}, {transform_indices = @transform_2, window_bounds = array<i64: 128, 128>}, {transform_indices = @transform_3, window_bounds = array<i64: 128, 128>}]} {
    %c0_i32 = arith.constant 0 : i32
    %0 = arith.cmpi eq, %arg1, %c0_i32 : i32
    %1 = arith.extui %0 : i1 to i32
    %c0_i32_0 = arith.constant 0 : i32
    %2 = arith.cmpi ne, %1, %c0_i32_0 : i32
    scf.if %2 {
      %c0_6 = arith.constant 0 : index
      %c0_7 = arith.constant 0 : index
      %7 = vector.load %arg2[%c0_6, %c0_7] : memref<128x128xbf16, #tpu.memory_space<vmem>>, vector<128x128xbf16>
      %c0_8 = arith.constant 0 : index
      %c0_9 = arith.constant 0 : index
      %8 = vector.load %arg3[%c0_8, %c0_9] : memref<128x128xbf16, #tpu.memory_space<vmem>>, vector<128x128xbf16>
      %cst_10 = arith.constant dense<0.000000e+00> : vector<128x128xf32>
      %9 = tpu.matmul %7, %8, %cst_10 {dimension_numbers = #tpu.dot_dimension_numbers<[1], [0], [0], [1], [0, 0, 1, 1], [], []>} : vector<128x128xbf16>, vector<128x128xbf16>, vector<128x128xf32> -> vector<128x128xf32>
      %10 = arith.truncf %9 : vector<128x128xf32> to vector<128x128xbf16>
      %c0_11 = arith.constant 0 : index
      %c0_12 = arith.constant 0 : index
      %11 = vector.load %arg6[%c0_11, %c0_12] : memref<128x128xbf16, #tpu.memory_space<vmem>>, vector<128x128xbf16>
      tpu.vector_store %arg6[%c0_11, %c0_12], %10 {strides = array<i32>} : memref<128x128xbf16, #tpu.memory_space<vmem>>, vector<128x128xbf16>,
    } else {
    }
    %c0 = arith.constant 0 : index
    %c0_1 = arith.constant 0 : index
    %3 = vector.load %arg6[%c0, %c0_1] : memref<128x128xbf16, #tpu.memory_space<vmem>>, vector<128x128xbf16>
    %c0_2 = arith.constant 0 : index
    %c0_3 = arith.constant 0 : index
    %4 = vector.load %arg4[%c0_2, %c0_3] : memref<128x128xbf16, #tpu.memory_space<vmem>>, vector<128x128xbf16>
    %cst = arith.constant dense<0.000000e+00> : vector<128x128xf32>
    %5 = tpu.matmul %3, %4, %cst {dimension_numbers = #tpu.dot_dimension_numbers<[1], [0], [0], [1], [0, 0, 1, 1], [], []>} : vector<128x128xbf16>, vector<128x128xbf16>, vector<128x128xf32> -> vector<128x128xf32>
    %c0_4 = arith.constant 0 : index
    %c0_5 = arith.constant 0 : index
    %6 = vector.load %arg5[%c0_4, %c0_5] : memref<128x128xf32, #tpu.memory_space<vmem>>, vector<128x128xf32>
    tpu.vector_store %arg5[%c0_4, %c0_5], %5 {strides = array<i32>} : memref<128x128xf32, #tpu.memory_space<vmem>>, vector<128x128xf32>,
    return
  }
  func.func @transform_0(%arg0: i32, %arg1: i32) -> (i32, i32) {
    %c0_i32 = arith.constant 0 : i32
    %c0_i32_0 = arith.constant 0 : i32
    return %arg0, %c0_i32 : i32, i32
  }
  func.func @transform_1(%arg0: i32, %arg1: i32) -> (i32, i32) {
    %c0_i32 = arith.constant 0 : i32
    %c0_i32_0 = arith.constant 0 : i32
    %c0_i32_1 = arith.constant 0 : i32
    return %c0_i32, %c0_i32_0 : i32, i32
  }
  func.func @transform_2(%arg0: i32, %arg1: i32) -> (i32, i32) {
    %c0_i32 = arith.constant 0 : i32
    %c0_i32_0 = arith.constant 0 : i32
    return %c0_i32, %arg1 : i32, i32
  }
  func.func @transform_3(%arg0: i32, %arg1: i32) -> (i32, i32) {
    %c0_i32 = arith.constant 0 : i32
    return %arg0, %arg1 : i32, i32
  }
}

module attributes {stable_mosaic.version = 11 : i64} {
  func.func @_metric_tensor_kernel(%arg0: i32, %arg1: i32, %arg2: memref<128x128xbf16, #tpu.memory_space<vmem>>, %arg3: memref<128x128xbf16, #tpu.memory_space<vmem>>, %arg4: memref<128x128xbf16, #tpu.memory_space<vmem>>, %arg5: memref<128x128xf32, #tpu.memory_space<vmem>>, %arg6: memref<128x128xbf16, #tpu.memory_space<vmem>>) attributes {dimension_semantics = [#tpu.dimension_semantics<parallel>, #tpu.dimension_semantics<arbitrary>], iteration_bounds = array<i64: 1, 1>, scalar_prefetch = 0 : i64, scratch_operands = 1 : i64, tpu.core_type = #tpu.core_type<tc>, window_params = [{transform_indices = @transform_0, window_bounds = array<i64: 128, 128>}, {pipeline_mode = #tpu.pipeline_mode<synchronous>, transform_indices = @transform_1, window_bounds = array<i64: 128, 128>}, {transform_indices = @transform_2, window_bounds = array<i64: 128, 128>}, {transform_indices = @transform_3, window_bounds = array<i64: 128, 128>}]} {
    %c0_i32 = arith.constant 0 : i32
    %0 = arith.cmpi eq, %arg1, %c0_i32 : i32
    %1 = arith.extui %0 : i1 to i32
    %c0_i32_0 = arith.constant 0 : i32
    %2 = arith.cmpi ne, %1, %c0_i32_0 : i32
    scf.if %2 {
      %c0_6 = arith.constant 0 : index
      %c0_7 = arith.constant 0 : index
      %7 = vector.load %arg2[%c0_6, %c0_7] : memref<128x128xbf16, #tpu.memory_space<vmem>>, vector<128x128xbf16>
      %c0_8 = arith.constant 0 : index
      %c0_9 = arith.constant 0 : index
      %8 = vector.load %arg3[%c0_8, %c0_9] : memref<128x128xbf16, #tpu.memory_space<vmem>>, vector<128x128xbf16>
      %cst_10 = arith.constant dense<0.000000e+00> : vector<128x128xf32>
      %9 = tpu.matmul %7, %8, %cst_10 {dimension_numbers = #tpu.dot_dimension_numbers<[1], [0], [0], [1], [0, 0, 1, 1], [], []>} : vector<128x128xbf16>, vector<128x128xbf16>, vector<128x128xf32> -> vector<128x128xf32>
      %10 = arith.truncf %9 : vector<128x128xf32> to vector<128x128xbf16>
      %c0_11 = arith.constant 0 : index
      %c0_12 = arith.constant 0 : index
      %11 = vector.load %arg6[%c0_11, %c0_12] : memref<128x128xbf16, #tpu.memory_space<vmem>>, vector<128x128xbf16>
      tpu.vector_store %arg6[%c0_11, %c0_12], %10 {strides = array<i32>} : memref<128x128xbf16, #tpu.memory_space<vmem>>, vector<128x128xbf16>,
    } else {
    }
    %c0 = arith.constant 0 : index
    %c0_1 = arith.constant 0 : index
    %3 = vector.load %arg6[%c0, %c0_1] : memref<128x128xbf16, #tpu.memory_space<vmem>>, vector<128x128xbf16>
    %c0_2 = arith.constant 0 : index
    %c0_3 = arith.constant 0 : index
    %4 = vector.load %arg4[%c0_2, %c0_3] : memref<128x128xbf16, #tpu.memory_space<vmem>>, vector<128x128xbf16>
    %cst = arith.constant dense<0.000000e+00> : vector<128x128xf32>
    %5 = tpu.matmul %3, %4, %cst {dimension_numbers = #tpu.dot_dimension_numbers<[1], [0], [0], [1], [0, 0, 1, 1], [], []>} : vector<128x128xbf16>, vector<128x128xbf16>, vector<128x128xf32> -> vector<128x128xf32>
    %c0_4 = arith.constant 0 : index
    %c0_5 = arith.constant 0 : index
    %6 = vector.load %arg5[%c0_4, %c0_5] : memref<128x128xf32, #tpu.memory_space<vmem>>, vector<128x128xf32>
    tpu.vector_store %arg5[%c0_4, %c0_5], %5 {strides = array<i32>} : memref<128x128xf32, #tpu.memory_space<vmem>>, vector<128x128xf32>,
    return
  }
  func.func @transform_0(%arg0: i32, %arg1: i32) -> (i32, i32) {
    %c0_i32 = arith.constant 0 : i32
    %c0_i32_0 = arith.constant 0 : i32
    return %arg0, %c0_i32 : i32, i32
  }
  func.func @transform_1(%arg0: i32, %arg1: i32) -> (i32, i32) {
    %c0_i32 = arith.constant 0 : i32
    %c0_i32_0 = arith.constant 0 : i32
    %c0_i32_1 = arith.constant 0 : i32
    return %c0_i32, %c0_i32_0 : i32, i32
  }
  func.func @transform_2(%arg0: i32, %arg1: i32) -> (i32, i32) {
    %c0_i32 = arith.constant 0 : i32
    %c0_i32_0 = arith.constant 0 : i32
    return %c0_i32, %arg1 : i32, i32
  }
  func.func @transform_3(%arg0: i32, %arg1: i32) -> (i32, i32) {
    %c0_i32 = arith.constant 0 : i32
    return %arg0, %arg1 : i32, i32
  }
}

</mosaic_0001>

<bundles_post_ra>
// kernel: tpu_custom_call.1
= control target key start
LH: loop header
LB: loop body
LE: loop exit
PB: predicated region body
PF: predicated region fallthrough
CT: control target
= control target key end

     0   :  { %8 = vsyncpa [#allocation4], 0  ;;  %s998_s0 = inlined_call_operand.hbm [shape: bf16[128,128], index: 0, kind: input, shape index: {}]   ;;  %s999_s1 = inlined_call_operand.hbm [shape: bf16[128,128], index: 1, kind: input, shape index: {}]   ;;  %s1000_s2 = inlined_call_operand.hbm [shape: bf16[128,128], index: 2, kind: input, shape index: {}]   ;;  %s1001_s3 = inlined_call_operand.hbm [shape: f32[128,128], index: 3, kind: output, shape index: {}]  }
   0x1   :  { %9 = vsyncpa [#allocation7], 0 }
   0x2   :  { %10 = vsyncpa [#allocation5], 0  ;;  %s958_s12 = smov [#allocation6]   ;;  %s959_s14 = smov [#allocation3]  }
   0x3   :  { %s28_s13 = sshll.u32 %s958_s12, 4  ;;  %s16_s15 = sshll.u32 %s959_s14, 4  ;;  %s29_s13 = int_to_ptr.vmem [resolvable:$true] %s28_s13  ;;  %s17_s15 = int_to_ptr.vmem [resolvable:$true] %s16_s15 }
   0x4   :  { %s880_s16 = scalar_lea.vmem %s29_s13, 1024  ;;  %p885_p1 = scmp.lt.s32.totalorder %s29_s13, %s29_s13 }
   0x5   :  { %p881_p0 = scmp.ne.s32.totalorder %s29_s13, %s880_s16  ;;  %p886_p2 = scmp.lt.s32.totalorder %s880_s16, %s880_s16 }
   0x7   :  { %p887_p3 = por %p886_p2, %p885_p1 }
   0x9   :  { %p888_p4 = pnand %p887_p3, %p881_p0 }
   0xb   :  { %891 = shalt.err (!%p888_p4)
}
   0xc   :  { %s960_s17 = smov 64   ;;  %s961_s18 = smov 4  }
   0xd   :  { %34 = dma.hbm_to_vmem [thread:$0]  %s999_s1, 1024, %s29_s13, [#allocation7], %s960_s17, %s960_s17, %s961_s18  }
   0xe   :  { %s900_s21 = scalar_lea.vmem %s17_s15, 1024  ;;  %p905_p6 = scmp.lt.s32.totalorder %s17_s15, %s17_s15 }
   0xf   :  { %p901_p5 = scmp.ne.s32.totalorder %s17_s15, %s900_s21  ;;  %p906_p7 = scmp.lt.s32.totalorder %s900_s21, %s900_s21 }
  0x11   :  { %p907_p8 = por %p906_p7, %p905_p6 }
  0x13   :  { %p908_p9 = pnand %p907_p8, %p901_p5 }
  0x15   :  { %911 = shalt.err (!%p908_p9)
}
  0x16   :  { %22 = dma.hbm_to_vmem [thread:$0]  %s998_s0, 1024, %s17_s15, [#allocation4], %s960_s17, %s960_s17, %s961_s18  }
  0x17   :  { %s962_s24 = smov [#allocation8]  }
  0x18   :  { %s40_s25 = sshll.u32 %s962_s24, 4  ;;  %s41_s25 = int_to_ptr.vmem [resolvable:$true] %s40_s25 }
  0x19   :  { %s920_s26 = scalar_lea.vmem %s41_s25, 1024  ;;  %p925_p11 = scmp.lt.s32.totalorder %s41_s25, %s41_s25 }
  0x1a   :  { %p921_p10 = scmp.ne.s32.totalorder %s41_s25, %s920_s26  ;;  %p926_p12 = scmp.lt.s32.totalorder %s920_s26, %s920_s26 }
  0x1c   :  { %p927_p13 = por %p926_p12, %p925_p11 }
  0x1e   :  { %p928_p0 = pnand %p927_p13, %p921_p10 }
  0x20   :  { %931 = shalt.err (!%p928_p0)
}
  0x21   :  { %46 = dma.hbm_to_vmem [thread:$0]  %s1000_s2, 1024, %s41_s25, [#allocation7], %s960_s17, %s960_s17, %s961_s18  }
  0x22   :  { %952 = dma.done.wait [#allocation4], 1024  }
  0x23   :  { %953 = vsyncadd [#allocation4], 4294966272 }
  0x24   :  { %954 = dma.done.wait [#allocation7], 2048  }
  0x25   :  { %955 = vsyncadd [#allocation7], 4294965248  ;;  %v840_v0 = vld [vmem:[#allocation6 + $0x38] sm:$0xff]   ;;  %v841_v1 = vld [vmem:[#allocation6 + $0x30] sm:$0xff]   ;;  %s963_s0 = smov [#allocation9]  }
  0x26   :  { %768 = vmatprep.subr.bf16.mxu0 %v840_v0  ;;  %v842_v2 = vld [vmem:[#allocation6 + $0x28] sm:$0xff]   ;;  %v843_v3 = vld [vmem:[#allocation6 + $0x20] sm:$0xff]   ;;  %v844_v5 = vld [vmem:[#allocation6 + $0x18] sm:$0xff]   ;;  %s612_s2 = sshll.u32 %s963_s0, 4  ;;  %s613_s2 = int_to_ptr.vmem [resolvable:$true] %s612_s2 }
  0x27   :  { %769 = vmatpush3.bf16.msra.mxu0 %v840_v0  ;;  %v848_v4 = vld [vmem:[#allocation3] sm:$0xff]   ;;  %v845_v6 = vld [vmem:[#allocation6 + $0x10] sm:$0xff]   ;;  %v856_v7 = vld [vmem:[#allocation8 + $0x38] sm:$0xff]   ;;  %s932_s28 = scalar_lea.vmem %s613_s2, 2048  ;;  %p937_p2 = scmp.lt.s32.totalorder %s613_s2, %s613_s2 }
  0x28   :  { %770 = vmatprep.subr.bf16.mxu0 %v841_v1  ;;  %784 = vmatprep.mubr.bf16.mxu0 %v848_v4  ;;  %v857_v8 = vld [vmem:[#allocation8 + $0x30] sm:$0xff]   ;;  %v846_v9 = vld [vmem:[#allocation6 + $0x8] sm:$0xff]   ;;  %v847_v11 = vld [vmem:[#allocation6] sm:$0xff]   ;;  %p933_p1 = scmp.ne.s32.totalorder %s613_s2, %s932_s28  ;;  %p938_p3 = scmp.lt.s32.totalorder %s932_s28, %s932_s28 }
  0x29   :  { %800 = vmatprep.subr.bf16.mxu1 %v856_v7  ;;  %v858_v10 = vld [vmem:[#allocation8 + $0x28] sm:$0xff]   ;;  %v850_v13 = vld [vmem:[#allocation3 + $0x10] sm:$0xff]   ;;  %v851_v14 = vld [vmem:[#allocation3 + $0x18] sm:$0xff]  }
  0x2a   :  { %801 = vmatpush3.bf16.msra.mxu1 %v856_v7  ;;  %v849_v12 = vld [vmem:[#allocation3 + $0x8] sm:$0xff]   ;;  %v852_v15 = vld [vmem:[#allocation3 + $0x20] sm:$0xff]   ;;  %v854_v17 = vld [vmem:[#allocation3 + $0x30] sm:$0xff]   ;;  %p939_p4 = por %p938_p3, %p937_p2 }
  0x2b   :  { %771 = vmatpush3.bf16.msra.mxu0 %v841_v1  ;;  %802 = vmatprep.subr.bf16.mxu1 %v857_v8  ;;  %v853_v16 = vld [vmem:[#allocation3 + $0x28] sm:$0xff]   ;;  %v855_v18 = vld [vmem:[#allocation3 + $0x38] sm:$0xff]   ;;  %v859_v19 = vld [vmem:[#allocation8 + $0x20] sm:$0xff]  }
  0x2c   :  { %772 = vmatprep.subr.bf16.mxu0 %v842_v2  ;;  %v860_v20 = vld [vmem:[#allocation8 + $0x18] sm:$0xff]   ;;  %v861_v21 = vld [vmem:[#allocation8 + $0x10] sm:$0xff]   ;;  %v862_v22 = vld [vmem:[#allocation8 + $0x8] sm:$0xff]   ;;  %p940_p5 = pnand %p939_p4, %p933_p1 }
  0x2d   :  { %v863_v23 = vld [vmem:[#allocation8] sm:$0xff]  }
  0x2e   :  { %803 = vmatpush3.bf16.msra.mxu1 %v857_v8 }
  0x2f   :  { %773 = vmatpush3.bf16.msra.mxu0 %v842_v2  ;;  %804 = vmatprep.subr.bf16.mxu1 %v858_v10 }
  0x30   :  { %774 = vmatprep.subr.bf16.mxu0 %v843_v3 }
  0x32   :  { %805 = vmatpush3.bf16.msra.mxu1 %v858_v10 }
  0x33   :  { %775 = vmatpush3.bf16.msra.mxu0 %v843_v3  ;;  %806 = vmatprep.subr.bf16.mxu1 %v859_v19 }
  0x34   :  { %776 = vmatprep.subr.bf16.mxu0 %v844_v5 }
  0x36   :  { %807 = vmatpush3.bf16.msra.mxu1 %v859_v19 }
  0x37   :  { %777 = vmatpush3.bf16.msra.mxu0 %v844_v5  ;;  %808 = vmatprep.subr.bf16.mxu1 %v860_v20 }
  0x38   :  { %778 = vmatprep.subr.bf16.mxu0 %v845_v6 }
  0x3a   :  { %809 = vmatpush3.bf16.msra.mxu1 %v860_v20 }
  0x3b   :  { %779 = vmatpush3.bf16.msra.mxu0 %v845_v6  ;;  %810 = vmatprep.subr.bf16.mxu1 %v861_v21 }
  0x3c   :  { %780 = vmatprep.subr.bf16.mxu0 %v846_v9 }
  0x3e   :  { %811 = vmatpush3.bf16.msra.mxu1 %v861_v21 }
  0x3f   :  { %781 = vmatpush3.bf16.msra.mxu0 %v846_v9  ;;  %812 = vmatprep.subr.bf16.mxu1 %v862_v22 }
  0x40   :  { %782 = vmatprep.subr.bf16.mxu0 %v847_v11 }
  0x42   :  { %813 = vmatpush3.bf16.msra.mxu1 %v862_v22 }
  0x43   :  { %783 = vmatpush3.bf16.msra.mxu0 %v847_v11  ;;  %814 = vmatprep.subr.bf16.mxu1 %v863_v23 }
  0x46   :  { %785 = vmatmul.mubr.bf16.vlgmr.msra.gmra.mxu0 %v849_v12  ;;  %815 = vmatpush3.bf16.msra.mxu1 %v863_v23 }
  0x47   :  { %788 = vmatprep.mubr.bf16.mxu0 %v850_v13 }
  0x4e   :  { %789 = vmatmul.mubr.bf16.gmra.mxu0 %v851_v14 }
  0x4f   :  { %792 = vmatprep.mubr.bf16.mxu0 %v852_v15 }
  0x56   :  { %793 = vmatmul.mubr.bf16.gmra.mxu0 %v853_v16 }
  0x57   :  { %796 = vmatprep.mubr.bf16.mxu0 %v854_v17 }
  0x5e   :  { %797 = vmatmul.mubr.bf16.gmra.mxu0 %v855_v18 }
 0x106   :  { %v786_v24 = vpop.f32.mrf.mxu0 }
 0x108   :  { %v223_v25 = vpop.f32.mrf.mxu0 }
 0x10a   :  { %v787_v26 = vpop.f32.mrf.mxu0 }
 0x10b   :  { %v697_v27 = vpack.c.bf16 %v787_v26, %v786_v24 }
 0x10c   :  { %v226_v28 = vpop.f32.mrf.mxu0 }
 0x10d   :  { %729 = vst [vmem:[#allocation2 + $0x8] sm:$0xff] %v697_v27   ;;  %v692_v29 = vpack.c.bf16 %v226_v28, %v223_v25 }
 0x10e   :  { %v790_v30 = vpop.f32.mrf.mxu0 }
 0x10f   :  { %693 = vst [vmem:[#allocation2] sm:$0xff] %v692_v29  }
 0x110   :  { %v239_v31 = vpop.f32.mrf.mxu0 }
 0x112   :  { %v791_v32 = vpop.f32.mrf.mxu0 }
 0x113   :  { %v707_v33 = vpack.c.bf16 %v791_v32, %v790_v30 }
 0x114   :  { %v242_v34 = vpop.f32.mrf.mxu0  ;;  %v865_v38 = vld [vmem:[#allocation2 + $0x8] sm:$0xff]  }
 0x115   :  { %731 = vst [vmem:[#allocation2 + $0x18] sm:$0xff] %v707_v33   ;;  %v702_v35 = vpack.c.bf16 %v242_v34, %v239_v31 }
 0x116   :  { %v794_v36 = vpop.f32.mrf.mxu0  ;;  %v864_v37 = vld [vmem:[#allocation2] sm:$0xff]  }
 0x117   :  { %730 = vst [vmem:[#allocation2 + $0x10] sm:$0xff] %v702_v35   ;;  %816 = vmatprep.mubr.bf16.mxu1 %v864_v37 }
 0x118   :  { %v255_v39 = vpop.f32.mrf.mxu0  ;;  %817 = vmatmul.mubr.bf16.vlgmr.msra.gmra.mxu1 %v865_v38 }
 0x11a   :  { %v795_v40 = vpop.f32.mrf.mxu0 }
 0x11b   :  { %v717_v41 = vpack.c.bf16 %v795_v40, %v794_v36 }
 0x11c   :  { %v258_v42 = vpop.f32.mrf.mxu0  ;;  %v867_v46 = vld [vmem:[#allocation2 + $0x18] sm:$0xff]  }
 0x11d   :  { %733 = vst [vmem:[#allocation2 + $0x28] sm:$0xff] %v717_v41   ;;  %v712_v43 = vpack.c.bf16 %v258_v42, %v255_v39 }
 0x11e   :  { %v798_v44 = vpop.f32.mrf.mxu0  ;;  %v866_v45 = vld [vmem:[#allocation2 + $0x10] sm:$0xff]  }
 0x11f   :  { %732 = vst [vmem:[#allocation2 + $0x20] sm:$0xff] %v712_v43   ;;  %820 = vmatprep.mubr.bf16.mxu1 %v866_v45 }
 0x120   :  { %v271_v47 = vpop.f32.mrf.mxu0  ;;  %821 = vmatmul.mubr.bf16.gmra.mxu1 %v867_v46 }
 0x122   :  { %v799_v48 = vpop.f32.mrf.mxu0 }
 0x123   :  { %v727_v49 = vpack.c.bf16 %v799_v48, %v798_v44 }
 0x124   :  { %v274_v50 = vpop.f32.mrf.mxu0  ;;  %v869_v53 = vld [vmem:[#allocation2 + $0x28] sm:$0xff]  }
 0x125   :  { %735 = vst [vmem:[#allocation2 + $0x38] sm:$0xff] %v727_v49   ;;  %v722_v51 = vpack.c.bf16 %v274_v50, %v271_v47 }
 0x126   :  { %v868_v52 = vld [vmem:[#allocation2 + $0x20] sm:$0xff]  }
 0x127   :  { %734 = vst [vmem:[#allocation2 + $0x30] sm:$0xff] %v722_v51   ;;  %824 = vmatprep.mubr.bf16.mxu1 %v868_v52 }
 0x128   :  { %825 = vmatmul.mubr.bf16.gmra.mxu1 %v869_v53 }
 0x12c   :  { %v871_v55 = vld [vmem:[#allocation2 + $0x38] sm:$0xff]  }
 0x12e   :  { %v870_v54 = vld [vmem:[#allocation2 + $0x30] sm:$0xff]  }
 0x12f   :  { %828 = vmatprep.mubr.bf16.mxu1 %v870_v54 }
 0x130   :  { %829 = vmatmul.mubr.bf16.gmra.mxu1 %v871_v55 }
 0x1d8   :  { %v818_v56 = vpop.f32.mrf.mxu1 }
 0x1d9   :  { %593 = vst [vmem:[#allocation9 + $0x10] sm:$0xff] %v818_v56 }
 0x1da   :  { %v528_v57 = vpop.f32.mrf.mxu1 }
 0x1db   :  { %591 = vst [vmem:[#allocation9] sm:$0xff] %v528_v57 }
 0x1dc   :  { %v819_v58 = vpop.f32.mrf.mxu1 }
 0x1dd   :  { %594 = vst [vmem:[#allocation9 + $0x18] sm:$0xff] %v819_v58 }
 0x1de   :  { %v531_v59 = vpop.f32.mrf.mxu1 }
 0x1df   :  { %592 = vst [vmem:[#allocation9 + $0x8] sm:$0xff] %v531_v59 }
 0x1e0   :  { %v822_v60 = vpop.f32.mrf.mxu1 }
 0x1e1   :  { %597 = vst [vmem:[#allocation9 + $0x30] sm:$0xff] %v822_v60 }
 0x1e2   :  { %v544_v61 = vpop.f32.mrf.mxu1 }
 0x1e3   :  { %595 = vst [vmem:[#allocation9 + $0x20] sm:$0xff] %v544_v61 }
 0x1e4   :  { %v823_v62 = vpop.f32.mrf.mxu1 }
 0x1e5   :  { %598 = vst [vmem:[#allocation9 + $0x38] sm:$0xff] %v823_v62 }
 0x1e6   :  { %v547_v63 = vpop.f32.mrf.mxu1 }
 0x1e7   :  { %596 = vst [vmem:[#allocation9 + $0x28] sm:$0xff] %v547_v63 }
 0x1e8   :  { %v826_v0 = vpop.f32.mrf.mxu1 }
 0x1e9   :  { %601 = vst [vmem:[#allocation9 + $0x50] sm:$0xff] %v826_v0 }
 0x1ea   :  { %v560_v1 = vpop.f32.mrf.mxu1 }
 0x1eb   :  { %599 = vst [vmem:[#allocation9 + $0x40] sm:$0xff] %v560_v1 }
 0x1ec   :  { %v827_v2 = vpop.f32.mrf.mxu1 }
 0x1ed   :  { %602 = vst [vmem:[#allocation9 + $0x58] sm:$0xff] %v827_v2 }
 0x1ee   :  { %v563_v3 = vpop.f32.mrf.mxu1 }
 0x1ef   :  { %600 = vst [vmem:[#allocation9 + $0x48] sm:$0xff] %v563_v3 }
 0x1f0   :  { %v830_v4 = vpop.f32.mrf.mxu1 }
 0x1f1   :  { %605 = vst [vmem:[#allocation9 + $0x70] sm:$0xff] %v830_v4 }
 0x1f2   :  { %v576_v5 = vpop.f32.mrf.mxu1 }
 0x1f3   :  { %603 = vst [vmem:[#allocation9 + $0x60] sm:$0xff] %v576_v5 }
 0x1f4   :  { %v831_v6 = vpop.f32.mrf.mxu1 }
 0x1f5   :  { %606 = vst [vmem:[#allocation9 + $0x78] sm:$0xff] %v831_v6 }
 0x1f6   :  { %v579_v7 = vpop.f32.mrf.mxu1 }
 0x1f7   :  { %604 = vst [vmem:[#allocation9 + $0x68] sm:$0xff] %v579_v7 }
 0x1f8   :  { %943 = shalt.err (!%p940_p5)
}
 0x1f9   :  { %s964_s29 = smov 128   ;;  %s965_s30 = smov 8  }
 0x1fa   :  { %618 = dma.vmem_to_hbm [thread:$0]  %s613_s2, 2048, %s1001_s3, [#allocation5], %s964_s29, %s964_s29, %s965_s30  }
 0x1fb   :  { %956 = dma.done.wait [#allocation5], 2048  }
 0x1fc   :  { %957 = vsyncadd [#allocation5], 4294965248 }
 0x1fd   :  { %622 = vsyncpa [#allocation4], 1 }
 0x1fe   :  { %623 = vsyncpa [#allocation7], 1 }
 0x1ff   :  { %624 = vsyncpa [#allocation5], 1 }

// kernel: tpu_custom_call.1
= control target key start
LH: loop header
LB: loop body
LE: loop exit
PB: predicated region body
PF: predicated region fallthrough
CT: control target
= control target key end

     0   :  { %8 = vsyncpa [#allocation4], 0  ;;  %s998_s0 = inlined_call_operand.hbm [shape: bf16[128,128], index: 0, kind: input, shape index: {}]   ;;  %s999_s1 = inlined_call_operand.hbm [shape: bf16[128,128], index: 1, kind: input, shape index: {}]   ;;  %s1000_s2 = inlined_call_operand.hbm [shape: bf16[128,128], index: 2, kind: input, shape index: {}]   ;;  %s1001_s3 = inlined_call_operand.hbm [shape: f32[128,128], index: 3, kind: output, shape index: {}]  }
   0x1   :  { %9 = vsyncpa [#allocation7], 0 }
   0x2   :  { %10 = vsyncpa [#allocation5], 0  ;;  %s958_s12 = smov [#allocation6]   ;;  %s959_s14 = smov [#allocation3]  }
   0x3   :  { %s28_s13 = sshll.u32 %s958_s12, 4  ;;  %s16_s15 = sshll.u32 %s959_s14, 4  ;;  %s29_s13 = int_to_ptr.vmem [resolvable:$true] %s28_s13  ;;  %s17_s15 = int_to_ptr.vmem [resolvable:$true] %s16_s15 }
   0x4   :  { %s880_s16 = scalar_lea.vmem %s29_s13, 1024  ;;  %p885_p1 = scmp.lt.s32.totalorder %s29_s13, %s29_s13 }
   0x5   :  { %p881_p0 = scmp.ne.s32.totalorder %s29_s13, %s880_s16  ;;  %p886_p2 = scmp.lt.s32.totalorder %s880_s16, %s880_s16 }
   0x7   :  { %p887_p3 = por %p886_p2, %p885_p1 }
   0x9   :  { %p888_p4 = pnand %p887_p3, %p881_p0 }
   0xb   :  { %891 = shalt.err (!%p888_p4)
}
   0xc   :  { %s960_s17 = smov 64   ;;  %s961_s18 = smov 4  }
   0xd   :  { %34 = dma.hbm_to_vmem [thread:$0]  %s999_s1, 1024, %s29_s13, [#allocation7], %s960_s17, %s960_s17, %s961_s18  }
   0xe   :  { %s900_s21 = scalar_lea.vmem %s17_s15, 1024  ;;  %p905_p6 = scmp.lt.s32.totalorder %s17_s15, %s17_s15 }
   0xf   :  { %p901_p5 = scmp.ne.s32.totalorder %s17_s15, %s900_s21  ;;  %p906_p7 = scmp.lt.s32.totalorder %s900_s21, %s900_s21 }
  0x11   :  { %p907_p8 = por %p906_p7, %p905_p6 }
  0x13   :  { %p908_p9 = pnand %p907_p8, %p901_p5 }
  0x15   :  { %911 = shalt.err (!%p908_p9)
}
  0x16   :  { %22 = dma.hbm_to_vmem [thread:$0]  %s998_s0, 1024, %s17_s15, [#allocation4], %s960_s17, %s960_s17, %s961_s18  }
  0x17   :  { %s962_s24 = smov [#allocation8]  }
  0x18   :  { %s40_s25 = sshll.u32 %s962_s24, 4  ;;  %s41_s25 = int_to_ptr.vmem [resolvable:$true] %s40_s25 }
  0x19   :  { %s920_s26 = scalar_lea.vmem %s41_s25, 1024  ;;  %p925_p11 = scmp.lt.s32.totalorder %s41_s25, %s41_s25 }
  0x1a   :  { %p921_p10 = scmp.ne.s32.totalorder %s41_s25, %s920_s26  ;;  %p926_p12 = scmp.lt.s32.totalorder %s920_s26, %s920_s26 }
  0x1c   :  { %p927_p13 = por %p926_p12, %p925_p11 }
  0x1e   :  { %p928_p0 = pnand %p927_p13, %p921_p10 }
  0x20   :  { %931 = shalt.err (!%p928_p0)
}
  0x21   :  { %46 = dma.hbm_to_vmem [thread:$0]  %s1000_s2, 1024, %s41_s25, [#allocation7], %s960_s17, %s960_s17, %s961_s18  }
  0x22   :  { %952 = dma.done.wait [#allocation4], 1024  }
  0x23   :  { %953 = vsyncadd [#allocation4], 4294966272 }
  0x24   :  { %954 = dma.done.wait [#allocation7], 2048  }
  0x25   :  { %955 = vsyncadd [#allocation7], 4294965248  ;;  %v840_v0 = vld [vmem:[#allocation6 + $0x38] sm:$0xff]   ;;  %v841_v1 = vld [vmem:[#allocation6 + $0x30] sm:$0xff]   ;;  %s963_s0 = smov [#allocation9]  }
  0x26   :  { %768 = vmatprep.subr.bf16.mxu0 %v840_v0  ;;  %v842_v2 = vld [vmem:[#allocation6 + $0x28] sm:$0xff]   ;;  %v843_v3 = vld [vmem:[#allocation6 + $0x20] sm:$0xff]   ;;  %v844_v5 = vld [vmem:[#allocation6 + $0x18] sm:$0xff]   ;;  %s612_s2 = sshll.u32 %s963_s0, 4  ;;  %s613_s2 = int_to_ptr.vmem [resolvable:$true] %s612_s2 }
  0x27   :  { %769 = vmatpush3.bf16.msra.mxu0 %v840_v0  ;;  %v848_v4 = vld [vmem:[#allocation3] sm:$0xff]   ;;  %v845_v6 = vld [vmem:[#allocation6 + $0x10] sm:$0xff]   ;;  %v856_v7 = vld [vmem:[#allocation8 + $0x38] sm:$0xff]   ;;  %s932_s28 = scalar_lea.vmem %s613_s2, 2048  ;;  %p937_p2 = scmp.lt.s32.totalorder %s613_s2, %s613_s2 }
  0x28   :  { %770 = vmatprep.subr.bf16.mxu0 %v841_v1  ;;  %784 = vmatprep.mubr.bf16.mxu0 %v848_v4  ;;  %v857_v8 = vld [vmem:[#allocation8 + $0x30] sm:$0xff]   ;;  %v846_v9 = vld [vmem:[#allocation6 + $0x8] sm:$0xff]   ;;  %v847_v11 = vld [vmem:[#allocation6] sm:$0xff]   ;;  %p933_p1 = scmp.ne.s32.totalorder %s613_s2, %s932_s28  ;;  %p938_p3 = scmp.lt.s32.totalorder %s932_s28, %s932_s28 }
  0x29   :  { %800 = vmatprep.subr.bf16.mxu1 %v856_v7  ;;  %v858_v10 = vld [vmem:[#allocation8 + $0x28] sm:$0xff]   ;;  %v850_v13 = vld [vmem:[#allocation3 + $0x10] sm:$0xff]   ;;  %v851_v14 = vld [vmem:[#allocation3 + $0x18] sm:$0xff]  }
  0x2a   :  { %801 = vmatpush3.bf16.msra.mxu1 %v856_v7  ;;  %v849_v12 = vld [vmem:[#allocation3 + $0x8] sm:$0xff]   ;;  %v852_v15 = vld [vmem:[#allocation3 + $0x20] sm:$0xff]   ;;  %v854_v17 = vld [vmem:[#allocation3 + $0x30] sm:$0xff]   ;;  %p939_p4 = por %p938_p3, %p937_p2 }
  0x2b   :  { %771 = vmatpush3.bf16.msra.mxu0 %v841_v1  ;;  %802 = vmatprep.subr.bf16.mxu1 %v857_v8  ;;  %v853_v16 = vld [vmem:[#allocation3 + $0x28] sm:$0xff]   ;;  %v855_v18 = vld [vmem:[#allocation3 + $0x38] sm:$0xff]   ;;  %v859_v19 = vld [vmem:[#allocation8 + $0x20] sm:$0xff]  }
  0x2c   :  { %772 = vmatprep.subr.bf16.mxu0 %v842_v2  ;;  %v860_v20 = vld [vmem:[#allocation8 + $0x18] sm:$0xff]   ;;  %v861_v21 = vld [vmem:[#allocation8 + $0x10] sm:$0xff]   ;;  %v862_v22 = vld [vmem:[#allocation8 + $0x8] sm:$0xff]   ;;  %p940_p5 = pnand %p939_p4, %p933_p1 }
  0x2d   :  { %v863_v23 = vld [vmem:[#allocation8] sm:$0xff]  }
  0x2e   :  { %803 = vmatpush3.bf16.msra.mxu1 %v857_v8 }
  0x2f   :  { %773 = vmatpush3.bf16.msra.mxu0 %v842_v2  ;;  %804 = vmatprep.subr.bf16.mxu1 %v858_v10 }
  0x30   :  { %774 = vmatprep.subr.bf16.mxu0 %v843_v3 }
  0x32   :  { %805 = vmatpush3.bf16.msra.mxu1 %v858_v10 }
  0x33   :  { %775 = vmatpush3.bf16.msra.mxu0 %v843_v3  ;;  %806 = vmatprep.subr.bf16.mxu1 %v859_v19 }
  0x34   :  { %776 = vmatprep.subr.bf16.mxu0 %v844_v5 }
  0x36   :  { %807 = vmatpush3.bf16.msra.mxu1 %v859_v19 }
  0x37   :  { %777 = vmatpush3.bf16.msra.mxu0 %v844_v5  ;;  %808 = vmatprep.subr.bf16.mxu1 %v860_v20 }
  0x38   :  { %778 = vmatprep.subr.bf16.mxu0 %v845_v6 }
  0x3a   :  { %809 = vmatpush3.bf16.msra.mxu1 %v860_v20 }
  0x3b   :  { %779 = vmatpush3.bf16.msra.mxu0 %v845_v6  ;;  %810 = vmatprep.subr.bf16.mxu1 %v861_v21 }
  0x3c   :  { %780 = vmatprep.subr.bf16.mxu0 %v846_v9 }
  0x3e   :  { %811 = vmatpush3.bf16.msra.mxu1 %v861_v21 }
  0x3f   :  { %781 = vmatpush3.bf16.msra.mxu0 %v846_v9  ;;  %812 = vmatprep.subr.bf16.mxu1 %v862_v22 }
  0x40   :  { %782 = vmatprep.subr.bf16.mxu0 %v847_v11 }
  0x42   :  { %813 = vmatpush3.bf16.msra.mxu1 %v862_v22 }
  0x43   :  { %783 = vmatpush3.bf16.msra.mxu0 %v847_v11  ;;  %814 = vmatprep.subr.bf16.mxu1 %v863_v23 }
  0x46   :  { %785 = vmatmul.mubr.bf16.vlgmr.msra.gmra.mxu0 %v849_v12  ;;  %815 = vmatpush3.bf16.msra.mxu1 %v863_v23 }
  0x47   :  { %788 = vmatprep.mubr.bf16.mxu0 %v850_v13 }
  0x4e   :  { %789 = vmatmul.mubr.bf16.gmra.mxu0 %v851_v14 }
  0x4f   :  { %792 = vmatprep.mubr.bf16.mxu0 %v852_v15 }
  0x56   :  { %793 = vmatmul.mubr.bf16.gmra.mxu0 %v853_v16 }
  0x57   :  { %796 = vmatprep.mubr.bf16.mxu0 %v854_v17 }
  0x5e   :  { %797 = vmatmul.mubr.bf16.gmra.mxu0 %v855_v18 }
 0x106   :  { %v786_v24 = vpop.f32.mrf.mxu0 }
 0x108   :  { %v223_v25 = vpop.f32.mrf.mxu0 }
 0x10a   :  { %v787_v26 = vpop.f32.mrf.mxu0 }
 0x10b   :  { %v697_v27 = vpack.c.bf16 %v787_v26, %v786_v24 }
 0x10c   :  { %v226_v28 = vpop.f32.mrf.mxu0 }
 0x10d   :  { %729 = vst [vmem:[#allocation2 + $0x8] sm:$0xff] %v697_v27   ;;  %v692_v29 = vpack.c.bf16 %v226_v28, %v223_v25 }
 0x10e   :  { %v790_v30 = vpop.f32.mrf.mxu0 }
 0x10f   :  { %693 = vst [vmem:[#allocation2] sm:$0xff] %v692_v29  }
 0x110   :  { %v239_v31 = vpop.f32.mrf.mxu0 }
 0x112   :  { %v791_v32 = vpop.f32.mrf.mxu0 }
 0x113   :  { %v707_v33 = vpack.c.bf16 %v791_v32, %v790_v30 }
 0x114   :  { %v242_v34 = vpop.f32.mrf.mxu0  ;;  %v865_v38 = vld [vmem:[#allocation2 + $0x8] sm:$0xff]  }
 0x115   :  { %731 = vst [vmem:[#allocation2 + $0x18] sm:$0xff] %v707_v33   ;;  %v702_v35 = vpack.c.bf16 %v242_v34, %v239_v31 }
 0x116   :  { %v794_v36 = vpop.f32.mrf.mxu0  ;;  %v864_v37 = vld [vmem:[#allocation2] sm:$0xff]  }
 0x117   :  { %730 = vst [vmem:[#allocation2 + $0x10] sm:$0xff] %v702_v35   ;;  %816 = vmatprep.mubr.bf16.mxu1 %v864_v37 }
 0x118   :  { %v255_v39 = vpop.f32.mrf.mxu0  ;;  %817 = vmatmul.mubr.bf16.vlgmr.msra.gmra.mxu1 %v865_v38 }
 0x11a   :  { %v795_v40 = vpop.f32.mrf.mxu0 }
 0x11b   :  { %v717_v41 = vpack.c.bf16 %v795_v40, %v794_v36 }
 0x11c   :  { %v258_v42 = vpop.f32.mrf.mxu0  ;;  %v867_v46 = vld [vmem:[#allocation2 + $0x18] sm:$0xff]  }
 0x11d   :  { %733 = vst [vmem:[#allocation2 + $0x28] sm:$0xff] %v717_v41   ;;  %v712_v43 = vpack.c.bf16 %v258_v42, %v255_v39 }
 0x11e   :  { %v798_v44 = vpop.f32.mrf.mxu0  ;;  %v866_v45 = vld [vmem:[#allocation2 + $0x10] sm:$0xff]  }
 0x11f   :  { %732 = vst [vmem:[#allocation2 + $0x20] sm:$0xff] %v712_v43   ;;  %820 = vmatprep.mubr.bf16.mxu1 %v866_v45 }
 0x120   :  { %v271_v47 = vpop.f32.mrf.mxu0  ;;  %821 = vmatmul.mubr.bf16.gmra.mxu1 %v867_v46 }
 0x122   :  { %v799_v48 = vpop.f32.mrf.mxu0 }
 0x123   :  { %v727_v49 = vpack.c.bf16 %v799_v48, %v798_v44 }
 0x124   :  { %v274_v50 = vpop.f32.mrf.mxu0  ;;  %v869_v53 = vld [vmem:[#allocation2 + $0x28] sm:$0xff]  }
 0x125   :  { %735 = vst [vmem:[#allocation2 + $0x38] sm:$0xff] %v727_v49   ;;  %v722_v51 = vpack.c.bf16 %v274_v50, %v271_v47 }
 0x126   :  { %v868_v52 = vld [vmem:[#allocation2 + $0x20] sm:$0xff]  }
 0x127   :  { %734 = vst [vmem:[#allocation2 + $0x30] sm:$0xff] %v722_v51   ;;  %824 = vmatprep.mubr.bf16.mxu1 %v868_v52 }
 0x128   :  { %825 = vmatmul.mubr.bf16.gmra.mxu1 %v869_v53 }
 0x12c   :  { %v871_v55 = vld [vmem:[#allocation2 + $0x38] sm:$0xff]  }
 0x12e   :  { %v870_v54 = vld [vmem:[#allocation2 + $0x30] sm:$0xff]  }
 0x12f   :  { %828 = vmatprep.mubr.bf16.mxu1 %v870_v54 }
 0x130   :  { %829 = vmatmul.mubr.bf16.gmra.mxu1 %v871_v55 }
 0x1d8   :  { %v818_v56 = vpop.f32.mrf.mxu1 }
 0x1d9   :  { %593 = vst [vmem:[#allocation9 + $0x10] sm:$0xff] %v818_v56 }
 0x1da   :  { %v528_v57 = vpop.f32.mrf.mxu1 }
 0x1db   :  { %591 = vst [vmem:[#allocation9] sm:$0xff] %v528_v57 }
 0x1dc   :  { %v819_v58 = vpop.f32.mrf.mxu1 }
 0x1dd   :  { %594 = vst [vmem:[#allocation9 + $0x18] sm:$0xff] %v819_v58 }
 0x1de   :  { %v531_v59 = vpop.f32.mrf.mxu1 }
 0x1df   :  { %592 = vst [vmem:[#allocation9 + $0x8] sm:$0xff] %v531_v59 }
 0x1e0   :  { %v822_v60 = vpop.f32.mrf.mxu1 }
 0x1e1   :  { %597 = vst [vmem:[#allocation9 + $0x30] sm:$0xff] %v822_v60 }
 0x1e2   :  { %v544_v61 = vpop.f32.mrf.mxu1 }
 0x1e3   :  { %595 = vst [vmem:[#allocation9 + $0x20] sm:$0xff] %v544_v61 }
 0x1e4   :  { %v823_v62 = vpop.f32.mrf.mxu1 }
 0x1e5   :  { %598 = vst [vmem:[#allocation9 + $0x38] sm:$0xff] %v823_v62 }
 0x1e6   :  { %v547_v63 = vpop.f32.mrf.mxu1 }
 0x1e7   :  { %596 = vst [vmem:[#allocation9 + $0x28] sm:$0xff] %v547_v63 }
 0x1e8   :  { %v826_v0 = vpop.f32.mrf.mxu1 }
 0x1e9   :  { %601 = vst [vmem:[#allocation9 + $0x50] sm:$0xff] %v826_v0 }
 0x1ea   :  { %v560_v1 = vpop.f32.mrf.mxu1 }
 0x1eb   :  { %599 = vst [vmem:[#allocation9 + $0x40] sm:$0xff] %v560_v1 }
 0x1ec   :  { %v827_v2 = vpop.f32.mrf.mxu1 }
 0x1ed   :  { %602 = vst [vmem:[#allocation9 + $0x58] sm:$0xff] %v827_v2 }
 0x1ee   :  { %v563_v3 = vpop.f32.mrf.mxu1 }
 0x1ef   :  { %600 = vst [vmem:[#allocation9 + $0x48] sm:$0xff] %v563_v3 }
 0x1f0   :  { %v830_v4 = vpop.f32.mrf.mxu1 }
 0x1f1   :  { %605 = vst [vmem:[#allocation9 + $0x70] sm:$0xff] %v830_v4 }
 0x1f2   :  { %v576_v5 = vpop.f32.mrf.mxu1 }
 0x1f3   :  { %603 = vst [vmem:[#allocation9 + $0x60] sm:$0xff] %v576_v5 }
 0x1f4   :  { %v831_v6 = vpop.f32.mrf.mxu1 }
 0x1f5   :  { %606 = vst [vmem:[#allocation9 + $0x78] sm:$0xff] %v831_v6 }
 0x1f6   :  { %v579_v7 = vpop.f32.mrf.mxu1 }
 0x1f7   :  { %604 = vst [vmem:[#allocation9 + $0x68] sm:$0xff] %v579_v7 }
 0x1f8   :  { %943 = shalt.err (!%p940_p5)
}
 0x1f9   :  { %s964_s29 = smov 128   ;;  %s965_s30 = smov 8  }
 0x1fa   :  { %618 = dma.vmem_to_hbm [thread:$0]  %s613_s2, 2048, %s1001_s3, [#allocation5], %s964_s29, %s964_s29, %s965_s30  }
 0x1fb   :  { %956 = dma.done.wait [#allocation5], 2048  }
 0x1fc   :  { %957 = vsyncadd [#allocation5], 4294965248 }
 0x1fd   :  { %622 = vsyncpa [#allocation4], 1 }
 0x1fe   :  { %623 = vsyncpa [#allocation7], 1 }
 0x1ff   :  { %624 = vsyncpa [#allocation5], 1 }

</bundles_post_ra>
